<compile_context>
chip_gen: v6e
topology: v6e:2x2x1
jax: 0.10.0
libtpu: 0.0.40
codegen_flags: <defaults>
</compile_context>

<pallas_src>
import jax
import jax.numpy as jnp
from jax.experimental import pallas as pl
from jax.experimental.pallas import tpu as pltpu

LANE = 128
ROW_TILE = 2048   # rows per grid step (f32 tile = 1 MiB, bf16 = 0.5 MiB)
NCORES = 2        # leading "parallel" axis (v7x megacore; harmless elsewhere)


def _cdiv(a, b):
    return -(-a // b)


def _make_l1_kernel(rows, row_tile, steps, needs_mask):
    """sum(|x - y|) accumulated into a per-core (8, LANE) f32 slab."""

    def kernel(x_ref, y_ref, acc_ref):
        c = pl.program_id(0)   # parallel (core) axis
        k = pl.program_id(1)   # reduction axis

        @pl.when(k == 0)
        def _():
            acc_ref[...] = jnp.zeros_like(acc_ref)

        diff = jnp.abs(x_ref[...].astype(jnp.float32)
                       - y_ref[...].astype(jnp.float32))

        if needs_mask:
            # Mask rows past the logical end (boundary-block garbage) and the
            # fully-duplicated clamped tile on an over-running core.
            g = c * steps + k  # global (unclamped) tile index
            row_ids = g * row_tile + jax.lax.broadcasted_iota(
                jnp.int32, (row_tile, LANE), 0)
            diff = jnp.where(row_ids < rows, diff, 0.0)

        # Reduce only along the row axis into the vreg-shaped accumulator
        # (pure VPU adds); the cross-lane reduction is done once in the
        # wrapper.
        acc_ref[...] += diff.reshape(row_tile // 8, 8, LANE).sum(axis=0)

    return kernel


def _l1_sum_2d(x2, y2, rows):
    """sum(|x2 - y2|) over a (rows, LANE) slab via the Pallas kernel."""
    row_tile = min(ROW_TILE, ((rows + 7) // 8) * 8)
    num_tiles = _cdiv(rows, row_tile)
    steps = _cdiv(num_tiles, NCORES)
    needs_mask = (rows % row_tile != 0) or (NCORES * steps != num_tiles)

    def in_map(c, k):
        # Clamp so a core that runs past the last tile re-reads (and fully
        # masks) the final tile instead of addressing an out-of-range block.
        return (jnp.minimum(c * steps + k, num_tiles - 1), 0)

    kernel = _make_l1_kernel(rows, row_tile, steps, needs_mask)

    partial = pl.pallas_call(
        kernel,
        out_shape=jax.ShapeDtypeStruct((NCORES, 8, LANE), jnp.float32),
        grid_spec=pltpu.PrefetchScalarGridSpec(
            num_scalar_prefetch=0,
            grid=(NCORES, steps),
            in_specs=[
                pl.BlockSpec((row_tile, LANE), in_map),
                pl.BlockSpec((row_tile, LANE), in_map),
            ],
            out_specs=pl.BlockSpec((None, 8, LANE), lambda c, k: (c, 0, 0)),
        ),
        compiler_params=pltpu.CompilerParams(
            dimension_semantics=("parallel", "arbitrary")),
    )(x2, y2)

    return jnp.sum(partial)


def l1_loss(inp, tgt):
    """F.l1_loss(input, target) with default reduction='mean'."""
    assert inp.shape == tgt.shape, "l1_loss without broadcasting (matches spec)"
    n = inp.size
    if n == 0:
        return jnp.float32(jnp.nan)

    x = inp.reshape(-1)
    y = tgt.reshape(-1)

    # Ragged tail (< LANE elements): plain JAX, so we never materialize a
    # padded copy of the full operands.
    n_main = (n // LANE) * LANE
    total = jnp.float32(0.0)
    if n_main < n:
        total = total + jnp.sum(
            jnp.abs(x[n_main:].astype(jnp.float32)
                    - y[n_main:].astype(jnp.float32)))

    if n_main > 0:
        rows = n_main // LANE
        x2 = (x if n_main == n else x[:n_main]).reshape(rows, LANE)
        y2 = (y if n_main == n else y[:n_main]).reshape(rows, LANE)
        total = total + _l1_sum_2d(x2, y2, rows)

    # Mean reduction: divide by the ORIGINAL element count.
    return (total / jnp.float32(n)).astype(jnp.float32)


if __name__ == "__main__":
    key = jax.random.PRNGKey(0)
    k1, k2 = jax.random.split(key)
    shape = (2, 4, 16, 16)
    inp = jax.random.normal(k1, shape, dtype=jnp.float32)
    tgt = jax.random.normal(k2, shape, dtype=jnp.float32)

    out = l1_loss(inp, tgt)
    jax.block_until_ready(out)

    ref = jnp.mean(jnp.abs(inp - tgt))
    assert jnp.allclose(out, ref, rtol=1e-6, atol=1e-6), (out, ref)

    # Extra check: element count not a multiple of 128 exercises the masked
    # boundary-tile path plus the JAX tail path.
    k3, k4 = jax.random.split(k2)
    a = jax.random.normal(k3, (3, 5, 7, 11), dtype=jnp.float32)   # 1155 elems
    b = jax.random.normal(k4, (3, 5, 7, 11), dtype=jnp.float32)
    out2 = l1_loss(a, b)
    jax.block_until_ready(out2)
    ref2 = jnp.mean(jnp.abs(a - b))
    assert jnp.allclose(out2, ref2, rtol=1e-6, atol=1e-6), (out2, ref2)

    print("KERNEL_OK")
</pallas_src>

<mosaic_0001>
module attributes {stable_mosaic.version = 11 : i64} {
  func.func @kernel(%arg0: i32, %arg1: i32, %arg2: memref<16x128xf32, #tpu.memory_space<vmem>>, %arg3: memref<16x128xf32, #tpu.memory_space<vmem>>, %arg4: memref<1x8x128xf32, #tpu.memory_space<vmem>>) attributes {dimension_semantics = [#tpu.dimension_semantics<parallel>, #tpu.dimension_semantics<arbitrary>], iteration_bounds = array<i64: 2, 1>, scalar_prefetch = 0 : i64, scratch_operands = 0 : i64, tpu.core_type = #tpu.core_type<tc>, window_params = [{transform_indices = @transform_0, window_bounds = array<i64: 16, 128>}, {transform_indices = @transform_1, window_bounds = array<i64: 16, 128>}, {transform_indices = @transform_2, window_bounds = array<i64: 1, 8, 128>}]} {
    %c0_i32 = arith.constant 0 : i32
    %0 = arith.cmpi eq, %arg1, %c0_i32 : i32
    %1 = arith.extui %0 : i1 to i32
    %c0_i32_0 = arith.constant 0 : i32
    %2 = arith.cmpi ne, %1, %c0_i32_0 : i32
    scf.if %2 {
      %cst_12 = arith.constant 0.000000e+00 : f32
      %25 = vector.broadcast %cst_12 : f32 to vector<8x128xf32>
      %c0_13 = arith.constant 0 : index
      %c0_14 = arith.constant 0 : index
      %c0_15 = arith.constant 0 : index
      %26 = vector.load %arg4[%c0_13, %c0_14, %c0_15] : memref<1x8x128xf32, #tpu.memory_space<vmem>>, vector<1x8x128xf32>
      %27 = vector.shape_cast %26 : vector<1x8x128xf32> to vector<8x128xf32>
      %28 = vector.shape_cast %25 : vector<8x128xf32> to vector<1x8x128xf32>
      tpu.vector_store %arg4[%c0_13, %c0_14, %c0_15], %28 {strides = array<i32>} : memref<1x8x128xf32, #tpu.memory_space<vmem>>, vector<1x8x128xf32>,
    } else {
    }
    %c0 = arith.constant 0 : index
    %c0_1 = arith.constant 0 : index
    %3 = vector.load %arg2[%c0, %c0_1] : memref<16x128xf32, #tpu.memory_space<vmem>>, vector<16x128xf32>
    %c0_2 = arith.constant 0 : index
    %c0_3 = arith.constant 0 : index
    %4 = vector.load %arg3[%c0_2, %c0_3] : memref<16x128xf32, #tpu.memory_space<vmem>>, vector<16x128xf32>
    %5 = arith.subf %3, %4 : vector<16x128xf32>
    %6 = math.absf %5 : vector<16x128xf32>
    %c1_i32 = arith.constant 1 : i32
    %7 = arith.muli %arg0, %c1_i32 : i32
    %8 = arith.addi %7, %arg1 : i32
    %c16_i32 = arith.constant 16 : i32
    %9 = arith.muli %8, %c16_i32 : i32
    %10 = tpu.iota {dimensions = array<i32: 0>} : vector<16x128xi32>
    %11 = vector.broadcast %9 : i32 to vector<16x128xi32>
    %12 = arith.addi %11, %10 : vector<16x128xi32>
    %c16_i32_4 = arith.constant 16 : i32
    %13 = vector.broadcast %c16_i32_4 : i32 to vector<16x128xi32>
    %14 = arith.cmpi slt, %12, %13 : vector<16x128xi32>
    %cst = arith.constant 0.000000e+00 : f32
    %15 = vector.broadcast %cst : f32 to vector<16x128xf32>
    %16 = arith.select %14, %6, %15 : vector<16x128xi1>, vector<16x128xf32>
    %c0_5 = arith.constant 0 : index
    %c0_6 = arith.constant 0 : index
    %c0_7 = arith.constant 0 : index
    %17 = vector.load %arg4[%c0_5, %c0_6, %c0_7] : memref<1x8x128xf32, #tpu.memory_space<vmem>>, vector<1x8x128xf32>
    %18 = vector.shape_cast %17 : vector<1x8x128xf32> to vector<8x128xf32>
    %19 = vector.shape_cast %16 : vector<16x128xf32> to vector<2x8x128xf32>
    %cst_8 = arith.constant dense<0.000000e+00> : vector<8x128xf32>
    %20 = vector.multi_reduction <add>, %19, %cst_8 [0] : vector<2x8x128xf32> to vector<8x128xf32>
    %21 = arith.addf %18, %20 : vector<8x128xf32>
    %c0_9 = arith.constant 0 : index
    %c0_10 = arith.constant 0 : index
    %c0_11 = arith.constant 0 : index
    %22 = vector.load %arg4[%c0_9, %c0_10, %c0_11] : memref<1x8x128xf32, #tpu.memory_space<vmem>>, vector<1x8x128xf32>
    %23 = vector.shape_cast %22 : vector<1x8x128xf32> to vector<8x128xf32>
    %24 = vector.shape_cast %21 : vector<8x128xf32> to vector<1x8x128xf32>
    tpu.vector_store %arg4[%c0_9, %c0_10, %c0_11], %24 {strides = array<i32>} : memref<1x8x128xf32, #tpu.memory_space<vmem>>, vector<1x8x128xf32>,
    return
  }
  func.func @transform_0(%arg0: i32, %arg1: i32) -> (i32, i32) {
    %c1_i32 = arith.constant 1 : i32
    %0 = arith.muli %arg0, %c1_i32 : i32
    %1 = arith.addi %0, %arg1 : i32
    %c0_i32 = arith.constant 0 : i32
    %2 = arith.minsi %1, %c0_i32 : i32
    %c0_i32_0 = arith.constant 0 : i32
    %c0_i32_1 = arith.constant 0 : i32
    return %2, %c0_i32_0 : i32, i32
  }
  func.func @transform_1(%arg0: i32, %arg1: i32) -> (i32, i32) {
    %c1_i32 = arith.constant 1 : i32
    %0 = arith.muli %arg0, %c1_i32 : i32
    %1 = arith.addi %0, %arg1 : i32
    %c0_i32 = arith.constant 0 : i32
    %2 = arith.minsi %1, %c0_i32 : i32
    %c0_i32_0 = arith.constant 0 : i32
    %c0_i32_1 = arith.constant 0 : i32
    return %2, %c0_i32_0 : i32, i32
  }
  func.func @transform_2(%arg0: i32, %arg1: i32) -> (i32, i32, i32) {
    %c0_i32 = arith.constant 0 : i32
    %c0_i32_0 = arith.constant 0 : i32
    %c0_i32_1 = arith.constant 0 : i32
    return %arg0, %c0_i32, %c0_i32_0 : i32, i32, i32
  }
}

</mosaic_0001>

<bundles_post_ra>
// kernel: tpu_custom_call.1
= control target key start
LH: loop header
LB: loop body
LE: loop exit
PB: predicated region body
PF: predicated region fallthrough
CT: control target
= control target key end

     0   :  { %7 = vsyncpa [#allocation3], 0  ;;  %s861_s0 = inlined_call_operand.hbm [shape: f32[16,128], index: 0, kind: input, shape index: {}]   ;;  %s862_s1 = inlined_call_operand.hbm [shape: f32[16,128], index: 1, kind: input, shape index: {}]   ;;  %s863_s2 = inlined_call_operand.hbm [shape: f32[2,8,128], index: 2, kind: output, shape index: {}]  }
   0x1   :  { %9 = vsyncpa [#allocation3 + $0x1], 0 }
   0x2   :  { %10 = vsyncpa [#allocation6], 0 }
   0x3   :  { %12 = vsyncpa [#allocation6 + $0x1], 0 }
   0x4   :  { %13 = vsyncpa [#allocation4], 0 }
   0x5   :  { %15 = vsyncpa [#allocation4 + $0x1], 0  ;;  %s682_s9 = smov 0   ;;  %s684_s10 = smov 0  }
   0x6   :  { %s686_s11 = smov 0   ;;  %s688_s12 = smov 0  }
   0x7   :  { %s690_s13 = smov 0   ;;  %s692_s14 = smov 0  }
   0x8   :  { %s694_s15 = smov 0   ;;  %s696_s16 = smov 0  }
   0x9 LB: > { %s384_s17 = sadd.s32 4294967295, %s660_s16   ;;  %s385_s18 = sadd.s32 4294967294, %s660_s16   ;;  %s660_s16 = sphi %s696_s16, %s21_s16   ;;  %s656_s15 = sphi %s694_s15, %s882_s15   ;;  %s652_s14 = sphi %s692_s14, %s881_s14   ;;  %s648_s13 = sphi %s690_s13, %s851_s13   ;;  %s644_s12 = sphi %s688_s12, %s880_s12   ;;  %s640_s11 = sphi %s686_s11, %s879_s11   ;;  %s636_s10 = sphi %s684_s10, %s878_s10   ;;  %s632_s9 = sphi %s682_s9, %s877_s9  }
   0xa   : > { %s33_s19 = sadd.s32 1, %s656_s15  ;;  %p629_p1 = scmp.ne.s32.totalorder %s648_s13, 0 }
   0xb   : > { %p35_p0 = scmp.ge.s32.totalorder %s33_s19, 2  ;;  %p54_p2 = scmp.eq.s32.totalorder %s660_s16, 0 }
   0xc   : > { %p59_p3 = scmp.ne.s32.totalorder %s648_s13, %s644_s12  ;;  %p60_p5 = scmp.eq.s32.totalorder %s384_s17, 0 }
   0xd   : > { %s884_s19 = smov (%p35_p0, %s33_s19), 0  ;;  %p728_p4 = por %p629_p1, %p54_p2 }
   0xe   : > { %p732_p6 = por %p60_p5, %p59_p3  ;;  %s101_s22 = ssub.s32 %s656_s15, %s884_s19 }
   0xf   : > { %p102_p7 = scmp.eq.s32.totalorder %s101_s22, 0  ;;  %s104_s23 = sadd.s32 1, %s640_s11 }
  0x10   : > { %s867_s21 = scalar_select %p732_p6, 1, 0 }
  0x11   : > { %s740_s24 = scalar_select %p102_p7, %s640_s11, %s104_s23  }
  0x12   : > { %p114_p8 = scmp.ne.s32.totalorder %s640_s11, %s636_s10  ;;  %p115_p9 = scmp.eq.s32.totalorder %s384_s17, 1 }
  0x13   : > { %p120_p10 = scmp.ne.s32.totalorder %s636_s10, %s632_s9  ;;  %p121_p11 = scmp.eq.s32.totalorder %s385_s18, 1 }
  0x14   : > { %p746_p12 = por %p115_p9, %p114_p8  ;;  %p422_p1 = scmp.lt.s32.totalorder %s660_s16, 2 }
  0x15   : > { %p751_p0 = por %p121_p11, %p120_p10  ;;  %s662_s27 = smov [#allocation2]  }
  0x16   : > { %s868_s25 = scalar_select %p746_p12, 1, 0 }
  0x17   : > { %s869_s26 = scalar_select %p751_p0, 1, 0 }
  0x18   : > { %s155_s28 = sshll.u32 %s662_s27, 4  ;;  %p758_p2 = pnand %p422_p1, %p728_p4  ;;  %s156_s28 = int_to_ptr.vmem [resolvable:$true] %s155_s28 }
  0x19   : > { %s499_s4 = scalar_lea.hbm %s861_s0, 256 }
  0x1a   : > { %p500_p3 = scmp.ne.s32.totalorder %s861_s0, %s499_s4  ;;  %p501_p5 = pneg %p758_p2 }
  0x1b   : > { %p506_p8 = scmp.lt.s32.totalorder %s499_s4, %s499_s4 }
  0x1c   : > { %p502_p7 = pnand %p501_p5, %p500_p3 }
  0x1e   : > { %p503_p4 = pneg %p502_p7 }
  0x20   : > { %p508_p9 = pnand %p506_p8, %p503_p4 }
  0x22   : > { %511 = shalt.err (!%p508_p9)
}
  0x23   : > { %s512_s7 = scalar_lea.vmem %s156_s28, 256  ;;  %s519_s8 = scalar_lea.vmem %s156_s28, 512 }
  0x24   : > { %p513_p10 = scmp.ne.s32.totalorder %s156_s28, %s512_s7  ;;  %p520_p13 = scmp.lt.s32.totalorder %s156_s28, %s156_s28 }
  0x25   : > { %p521_p0 = scmp.lt.s32.totalorder %s519_s8, %s512_s7 }
  0x26   : > { %p515_p11 = pnand %p513_p10, %p501_p5 }
  0x27   : > { %p522_p12 = por %p521_p0, %p520_p13 }
  0x28   : > { %p516_p1 = pneg %p515_p11 }
  0x2a   : > { %p523_p6 = pnand %p522_p12, %p516_p1 }
  0x2c   : > { %526 = shalt.err (!%p523_p6)
}
  0x2d   : > { %s663_s12 = smov 128   ;;  %s664_s17 = smov 8  }
  0x2e   : > { %414 = dma.hbm_to_vmem [thread:$0]  (!%p758_p2), %s861_s0, 256, %s156_s28, [#allocation3], %s663_s12, %s663_s12, %s664_s17  }
  0x2f   : > { %p394_p3 = scmp.ge.s32.totalorder %s660_s16, 1  ;;  %p187_p7 = scmp.lt.s32.totalorder %s660_s16, 3 }
  0x30   : > { %s665_s23 = smov [#allocation5]   ;;  %s527_s4 = scalar_lea.hbm %s862_s1, 256 }
  0x31   : > { %p783_p4 = pnand %p394_p3, %p187_p7  ;;  %s179_s27 = sshll.u32 %s665_s23, 4  ;;  %s180_s27 = int_to_ptr.vmem [resolvable:$true] %s179_s27 }
  0x32   : > { %p528_p6 = scmp.ne.s32.totalorder %s862_s1, %s527_s4  ;;  %p534_p0 = scmp.lt.s32.totalorder %s527_s4, %s527_s4 }
  0x33   : > { %s871_s22 = scalar_select %p783_p4, 1, 0 }
  0x34   : > { %p530_p12 = pnand %p528_p6, %p501_p5 }
  0x36   : > { %p531_p13 = pneg %p530_p12 }
  0x38   : > { %p536_p8 = pnand %p534_p0, %p531_p13 }
  0x3a   : > { %539 = shalt.err (!%p536_p8)
}
  0x3b   : > { %s540_s28 = scalar_lea.vmem %s180_s27, 256  ;;  %s547_s7 = scalar_lea.vmem %s180_s27, 512 }
  0x3c   : > { %p541_p9 = scmp.ne.s32.totalorder %s180_s27, %s540_s28  ;;  %p548_p1 = scmp.lt.s32.totalorder %s180_s27, %s180_s27 }
  0x3d   : > { %p549_p3 = scmp.lt.s32.totalorder %s547_s7, %s540_s28 }
  0x3e   : > { %p543_p10 = pnand %p541_p9, %p501_p5 }
  0x3f   : > { %p550_p7 = por %p549_p3, %p548_p1 }
  0x40   : > { %p544_p11 = pneg %p543_p10 }
  0x42   : > { %p551_p4 = pnand %p550_p7, %p544_p11 }
  0x44   : > { %554 = shalt.err (!%p551_p4)
}
  0x45   : > { %417 = dma.hbm_to_vmem [thread:$0]  (!%p758_p2), %s862_s1, 256, %s180_s27, [#allocation6], %s663_s12, %s663_s12, %s664_s17  }
  0x46   : > { %p872_p6 = scmp.ne.s32.totalorder %s871_s22, 0 }
  0x47   : > { %s193_s20 = sand.u32 (!%p872_p6), 1, %s648_s13   ;;  %p873_p5 = scmp.ne.s32.totalorder (!%p872_p6), %s867_s21, 0 }
  0x48   : > { %191 = sbr.rel (%p872_p6) target bundleno = 107 (0x6b), region = 28  ;;  %s395_s23 = sshll.u32 (!%p872_p6), %s193_s20, 4 }
  0x49   : > { %s194_s30 = scalar_lea.sflag (!%p872_p6), [#allocation3], %s193_s20  ;;  %s197_s3 = scalar_lea.vmem (!%p872_p6), [#allocation2], %s395_s23 }
  0x4d   : > { %618 = dma.done.wait (%p873_p5), %s194_s30, 256  }
  0x4e   : > { %620 = vsyncadd (%p873_p5), %s194_s30, 4294967040  ;;  %s203_s29 = scalar_lea.sflag [#allocation6], %s193_s20  ;;  %s206_s4 = scalar_lea.vmem [#allocation5], %s395_s23 }
  0x4f   : > { %622 = dma.done.wait (%p873_p5), %s203_s29, 256  }
  0x50   : > { %624 = vsyncadd (%p873_p5), %s203_s29, 4294967040  ;;  %s398_s12 = sshll.u32 %s652_s14, 4  ;;  %v255_v0 = vlaneseq  ;;  %s229_s17 = sand.u32 1, %s636_s10   ;;  %v245_v6 = vld [vmem:[%s197_s3] sm:$0xff]  ;;  %v246_v7 = vld [vmem:[%s197_s3 + $0x8] sm:$0xff] }
  0x51   : > { %v258_v2 = vstv %s398_s12  ;;  %s397_s22 = sshll.u32 %s229_s17, 3  ;;  %v247_v8 = vld [vmem:[%s206_s4] sm:$0xff]  ;;  %v248_v9 = vld [vmem:[%s206_s4 + $0x8] sm:$0xff]  ;;  %s400_s21 = sshll.u32 %s652_s14, 7 }
  0x52   : > { %v256_v1 = vshrl.u32 %v255_v0, 7  ;;  %v249_v10 = vsub.f32 %v245_v6, %v247_v8  ;;  %v250_v11 = vsub.f32 %v246_v7, %v248_v9  ;;  %s231_s27 = scalar_lea.vmem [#allocation7], %s397_s22  ;;  %s281_s7 = scalar_lea.hbm %s863_s2, %s400_s21 }
  0x53   : > { %s283_s5 = sshll.u32 %s231_s27, 4  ;;  %s270_s8 = scalar_lea.sflag [#allocation4], %s229_s17  ;;  %s284_s5 = int_to_ptr.vmem [resolvable:$true] %s283_s5 }
  0x54   : > { %v257_v3 = vadd.s32 8, %v256_v1  ;;  %v259_v4 = vadd.s32 %v258_v2, %v256_v1  ;;  %v251_v12 = vand.u32 2147483647, %v249_v10  ;;  %v252_v13 = vand.u32 2147483647, %v250_v11  ;;  %s555_s18 = scalar_lea.vmem %s284_s5, 128 }
  0x55   : > { %p556_p2 = scmp.ne.s32.totalorder %s284_s5, %s555_s18  ;;  %p874_p4 = scmp.ne.s32.totalorder %s868_s25, 0 }
  0x56   : > { %v260_v5 = vadd.s32 %v258_v2, %v257_v3  ;;  %vm261_vm0 = vcmp.lt.s32.totalorder %v259_v4, 16  ;;  %s666_s20 = smov [#allocation7]  }
  0x57   : > { %v263_v14 = vsel %vm261_vm0, %v251_v12, 0.0  ;;  %p557_p12 = pnand %p556_p2, %p874_p4  ;;  %s559_s23 = sshll.u32 %s666_s20, 4  ;;  %s560_s23 = int_to_ptr.vmem [resolvable:$false] %s559_s23 }
  0x58   : > { %vm262_vm1 = vcmp.lt.s32.totalorder %v260_v5, 16  ;;  %s561_s30 = scalar_lea.vmem %s560_s23, 256  ;;  %p562_p0 = scmp.lt.s32.totalorder %s284_s5, %s560_s23 }
  0x59   : > { %v264_v15 = vsel %vm262_vm1, %v252_v13, 0.0  ;;  %p558_p13 = pneg %p557_p12  ;;  %p563_p8 = scmp.lt.s32.totalorder %s561_s30, %s555_s18 }
  0x5a   : > { %v266_v16 = vadd.f32 %v264_v15, %v263_v14 }
  0x5b   : > { %p564_p9 = por %p563_p8, %p562_p0 }
  0x5c   : > { %268 = vst [vmem:[%s231_s27] sm:$0xff] %v266_v16 }
  0x5d   : > { %p565_p10 = pnand %p564_p9, %p558_p13 }
  0x5f   : > { %568 = shalt.err (!%p565_p10)
}
  0x60   : > { %s569_s14 = scalar_lea.hbm %s281_s7, 128  ;;  %s573_s4 = scalar_lea.hbm %s863_s2, 256 }
  0x61   : > { %p570_p11 = scmp.ne.s32.totalorder %s281_s7, %s569_s14  ;;  %p574_p7 = scmp.lt.s32.totalorder %s281_s7, %s863_s2 }
  0x62   : > { %p575_p6 = scmp.lt.s32.totalorder %s573_s4, %s569_s14 }
  0x63   : > { %p571_p1 = pnand %p570_p11, %p874_p4 }
  0x64   : > { %p576_p5 = por %p575_p6, %p574_p7 }
  0x65   : > { %p572_p3 = pneg %p571_p1 }
  0x67   : > { %p577_p2 = pnand %p576_p5, %p572_p3 }
  0x69   : > { %580 = shalt.err (!%p577_p2)
}
  0x6a   : > { %409 = dma.vmem_to_hbm [thread:$0]  (%p874_p4), %s284_s5, 128, %s281_s7, %s270_s8  }
  0x6b PF: > { %s295_s22 = sand.u32 1, %s632_s9   ;;  %p875_p12 = scmp.ne.s32.totalorder %s869_s26, 0 }
  0x6c   : > { %p876_p13 = scmp.ge.s32.totalorder %s660_s16, 2  ;;  %s296_s21 = scalar_lea.sflag [#allocation4], %s295_s22 }
  0x6e   : > { %p419_p0 = pnand %p876_p13, %p875_p12 }
  0x70   : > { %p420_p8 = pneg %p419_p0 }
  0x72   : > { %626 = dma.done.wait (%p420_p8), %s296_s21, 128  }
  0x73   : > { %628 = vsyncadd (%p420_p8), %s296_s21, 4294967168  ;;  %s21_s16 = sadd.s32 1, %s660_s16   ;;  %s877_s9 = smov %s636_s10 }
  0x74   : > { %p18_p9 = scmp.ge.s32.totalorder %s21_s16, 4   ;;  %s878_s10 = smov %s640_s11 }
  0x75   : > { %s879_s11 = smov %s740_s24  ;;  %s880_s12 = smov %s648_s13 }
  0x76   : > { %s851_s13 = smov 0   ;;  %s881_s14 = smov %s656_s15 }
  0x77   : > { %s882_s15 = smov %s884_s19  ;;  %20 = sbr.rel (!%p18_p9) target bundleno = 9 (0x9), region = 90 }
  0x7c   :  { %301 = vsyncpa [#allocation3], 1 }
  0x7d   :  { %303 = vsyncpa [#allocation3 + $0x1], 1 }
  0x7e   :  { %304 = vsyncpa [#allocation6], 1 }
  0x7f   :  { %306 = vsyncpa [#allocation6 + $0x1], 1 }
  0x80   :  { %307 = vsyncpa [#allocation4], 1 }
  0x81   :  { %309 = vsyncpa [#allocation4 + $0x1], 1 }

</bundles_post_ra>
